<compile_context>
chip_gen: v7x
topology: tpu7x:2x2x1
jax: 0.10.0
libtpu: 0.0.40
codegen_flags: <defaults>
</compile_context>

<pallas_src>
import functools

import jax
import jax.numpy as jnp
from jax.experimental import pallas as pl
from jax.experimental.pallas import tpu as pltpu

NODE_FEATURES = 42
OUT_DIM = 1
EMBED_HIDDEN = 64   # MLP_embed hidden
EMBED_OUT = 32      # MLP_embed out / GCN width
PRED_HIDDEN = 32    # MLP_pred hidden
F_PAD = 48          # node features padded 42 -> 48 (aligned K for the 1st dot)

# ---- packed (transposed) weight slab: bf16, row offsets multiples of 16 -----
W_COLS = EMBED_HIDDEN                    # 64
R_W1E = 0                                # w1e^T [64, 42] (cols 42..47 zero)
R_W2E = R_W1E + EMBED_HIDDEN             # 64: w2e^T [32, 64]
R_WG1 = R_W2E + EMBED_OUT                # 96: wg1^T [32, 32]
R_WG2 = R_WG1 + EMBED_OUT                # 128: wg2^T [32, 32]
R_W1P = R_WG2 + EMBED_OUT                # 160: w1p^T [32, 32]
W_ROWS = R_W1P + PRED_HIDDEN             # 192

# ---- packed bias slab: f32 [64, 8], biases stored as COLUMNS ----------------
B_ROWS, B_COLS = 64, 8
# col 0: b1e[64]  col 1: b2e[32]  col 2: bg1[32]  col 3: bg2[32]
# col 4: b1p[32]  col 5: w2p[32] (final-layer weight column)  col 6 row 0: b2p


def temporal_skip_kernel(xT_ref, priors_ref, aT_ref, w_ref, b_ref, out_ref, *,
                         act_dtype):
    f32 = jnp.float32
    bf16 = jnp.bfloat16

    xT = xT_ref[...]                                # [F_PAD, TM] bf16
    aT = aT_ref[...]                                # [TM, TM] bf16, block-diag A^T

    # static slices of the packed (transposed) weight slab, bf16
    w1eT = w_ref[R_W1E:R_W1E + EMBED_HIDDEN, 0:F_PAD]        # [64, 48]
    w2eT = w_ref[R_W2E:R_W2E + EMBED_OUT, 0:EMBED_HIDDEN]    # [32, 64]
    wg1T = w_ref[R_WG1:R_WG1 + EMBED_OUT, 0:EMBED_OUT]       # [32, 32]
    wg2T = w_ref[R_WG2:R_WG2 + EMBED_OUT, 0:EMBED_OUT]       # [32, 32]
    w1pT = w_ref[R_W1P:R_W1P + PRED_HIDDEN, 0:EMBED_OUT]     # [32, 32]

    # bias columns (f32), broadcast along lanes
    b1e = b_ref[0:EMBED_HIDDEN, 0:1]                # [64, 1]
    b2e = b_ref[0:EMBED_OUT, 1:2]                   # [32, 1]
    bg1 = b_ref[0:EMBED_OUT, 2:3]
    bg2 = b_ref[0:EMBED_OUT, 3:4]
    b1p = b_ref[0:PRED_HIDDEN, 4:5]
    w2p = b_ref[0:PRED_HIDDEN, 5:6]                 # final-layer weight column
    b2p = b_ref[0:1, 6:7]                           # [1, 1]

    def act(z, fn):
        # f32 accumulate -> nonlinearity in act_dtype (bf16 on v6e/v7x, f32 on v5e)
        return fn(z.astype(act_dtype))

    # MLP_embed (transposed): tanh(W2e^T tanh(W1e^T x^T + b1e) + b2e)
    h = jnp.dot(w1eT, xT, preferred_element_type=f32) + b1e
    h = act(h, jnp.tanh)                                           # [64, TM]
    h = jnp.dot(w2eT, h.astype(bf16), preferred_element_type=f32) + b2e
    h = act(h, jnp.tanh)                                           # [32, TM]
    # dropout (eval mode) -> identity

    # GCN1: (h W)^T = W^T h^T, aggregate from the right with A^T, bias, relu
    g = jnp.dot(wg1T, h.astype(bf16), preferred_element_type=f32)
    g = jnp.dot(g.astype(bf16), aT, preferred_element_type=f32) + bg1
    g = act(g, lambda v: jnp.maximum(v, 0.0))                      # [32, TM]

    # GCN2
    g2 = jnp.dot(wg2T, g.astype(bf16), preferred_element_type=f32)
    g2 = jnp.dot(g2.astype(bf16), aT, preferred_element_type=f32) + bg2
    g2 = act(g2, lambda v: jnp.maximum(v, 0.0))                    # [32, TM]

    # MLP_pred: hidden layer on MXU; final 32->1 as a sublane (XLU) reduction
    p = jnp.dot(w1pT, g2.astype(bf16), preferred_element_type=f32) + b1p
    p = act(p, jnp.tanh)                                           # [32, TM]
    o = jnp.tanh(jnp.sum(p * w2p, axis=0, keepdims=True) + b2p)    # [1, TM] f32

    out_ref[...] = (o + priors_ref[...]).astype(out_ref.dtype)


# ---------------- one-time packing (hoisted out of the hot path) -------------
def pack_weights(params):
    w = jnp.zeros((W_ROWS, W_COLS), jnp.float32)
    w = w.at[R_W1E:R_W1E + EMBED_HIDDEN, :NODE_FEATURES].set(params["w1e"].T)
    w = w.at[R_W2E:R_W2E + EMBED_OUT, :EMBED_HIDDEN].set(params["w2e"].T)
    w = w.at[R_WG1:R_WG1 + EMBED_OUT, :EMBED_OUT].set(params["wg1"].T)
    w = w.at[R_WG2:R_WG2 + EMBED_OUT, :EMBED_OUT].set(params["wg2"].T)
    w = w.at[R_W1P:R_W1P + PRED_HIDDEN, :EMBED_OUT].set(params["w1p"].T)
    return w.astype(jnp.bfloat16)


def pack_biases(params):
    b = jnp.zeros((B_ROWS, B_COLS), jnp.float32)
    b = b.at[:EMBED_HIDDEN, 0].set(params["b1e"].reshape(-1))
    b = b.at[:EMBED_OUT, 1].set(params["b2e"].reshape(-1))
    b = b.at[:EMBED_OUT, 2].set(params["bg1"].reshape(-1))
    b = b.at[:EMBED_OUT, 3].set(params["bg2"].reshape(-1))
    b = b.at[:PRED_HIDDEN, 4].set(params["b1p"].reshape(-1))
    b = b.at[:PRED_HIDDEN, 5].set(params["w2p"].reshape(-1))    # [32,1] -> column
    b = b.at[0, 6].set(params["b2p"].reshape(()))
    return b


def prepare_inputs(params, a_norm, tile_m, n):
    """Call ONCE per model/graph (not per forward)."""
    tb = tile_m // n
    # block-diagonal A^T shared by every row block (tb complete timesteps)
    a_blockT = jnp.kron(jnp.eye(tb, dtype=jnp.float32),
                        a_norm.T).astype(jnp.bfloat16)
    return a_blockT, pack_weights(params), pack_biases(params)


# ---------------- per-call jitted wrapper ------------------------------------
@functools.partial(jax.jit, static_argnames=("tile_m", "act_dtype"))
def temporal_skip(x, priors, a_blockT, w_pack, b_pack, *, tile_m,
                  act_dtype=jnp.float32):
    """x: [T, N, 42], priors: [T, N, 1] -> [T, N, 1]."""
    T, N, F = x.shape
    assert F == NODE_FEATURES, F
    M = T * N
    assert M % tile_m == 0 and tile_m % N == 0, (T, N, tile_m)
    num_blocks = M // tile_m

    # transpose to feature-major, pad 42 -> 48 feature rows, pre-cast to bf16
    xT = jnp.swapaxes(x.reshape(M, F), 0, 1)                       # [42, M]
    xT = jnp.pad(xT, ((0, F_PAD - F), (0, 0))).astype(jnp.bfloat16)
    priors_row = priors.reshape(1, M).astype(jnp.float32)          # lane-dense

    out = pl.pallas_call(
        functools.partial(temporal_skip_kernel, act_dtype=act_dtype),
        out_shape=jax.ShapeDtypeStruct((1, M), jnp.float32),
        grid_spec=pltpu.PrefetchScalarGridSpec(
            num_scalar_prefetch=0,
            grid=(num_blocks,),
            in_specs=[
                pl.BlockSpec((F_PAD, tile_m), lambda i: (0, i)),
                pl.BlockSpec((1, tile_m), lambda i: (0, i)),
                # constant block index -> stays VMEM-resident across the grid
                pl.BlockSpec((tile_m, tile_m), lambda i: (0, 0)),
                pl.BlockSpec((W_ROWS, W_COLS), lambda i: (0, 0)),
                pl.BlockSpec((B_ROWS, B_COLS), lambda i: (0, 0)),
            ],
            out_specs=pl.BlockSpec((1, tile_m), lambda i: (0, i)),
        ),
        compiler_params=pltpu.CompilerParams(
            dimension_semantics=("parallel",),
        ),
    )(xT, priors_row, a_blockT, w_pack, b_pack)
    return out.reshape(T, N, OUT_DIM)


# ---------------- chip-dependent static choices ------------------------------
def pick_tile_m(T, N):
    M = T * N
    try:
        kind = jax.devices()[0].device_kind.lower()
    except Exception:
        kind = ""
    if "v7" in kind:                      # 2 TensorCores -> 1 block per core
        half = M // 2
        if M % 2 == 0 and half % N == 0 and half % 128 == 0:
            return half
    return M                              # single-TC (v5e/v6e): one grid step


def pick_act_dtype():
    try:
        kind = jax.devices()[0].device_kind.lower()
    except Exception:
        return jnp.float32
    if "v6" in kind or "v7" in kind:      # bf16 VPU/EUP paths exist
        return jnp.bfloat16
    return jnp.float32                    # v5e and older: keep elementwise f32


# ---------------- pure-JAX reference & setup ---------------------------------
def temporal_skip_ref(x, a_norm, priors, params):
    """Pure-JAX f32 reference (eval-mode dropout = identity)."""
    T, N, F = x.shape
    xf = x.reshape(T * N, F)
    h = jnp.tanh(xf @ params["w1e"] + params["b1e"])
    h = jnp.tanh(h @ params["w2e"] + params["b2e"]).reshape(T, N, EMBED_OUT)
    g = jnp.einsum("nm,tmf->tnf", a_norm, h @ params["wg1"]) + params["bg1"]
    g = jnp.maximum(g, 0.0)
    g2 = jnp.einsum("nm,tmf->tnf", a_norm, g @ params["wg2"]) + params["bg2"]
    g2 = jnp.maximum(g2, 0.0)
    p = jnp.tanh(g2 @ params["w1p"] + params["b1p"])
    o = jnp.tanh(p @ params["w2p"] + params["b2p"])
    return o + priors


def build_gcn_norm_adj(edge_index, n):
    """Dense D^{-1/2}(A+I)D^{-1/2} from a [2, E] edge_index (src, dst)."""
    src, dst = edge_index[0], edge_index[1]
    a = jnp.zeros((n, n), jnp.float32).at[dst, src].add(1.0)
    a = a + jnp.eye(n, dtype=jnp.float32)           # self loops
    deg = a.sum(axis=1)
    dinv = jnp.where(deg > 0, 1.0 / jnp.sqrt(deg), 0.0)
    return dinv[:, None] * a * dinv[None, :]


def init_params(key):
    """Deterministic synthetic parameters. Linear weights stored as [in, out]."""
    ks = jax.random.split(key, 16)

    def lin(kw, din, dout):
        return jax.random.normal(kw, (din, dout), jnp.float32) / jnp.sqrt(din)

    return {
        # MLP_embed: 42 -> 64 -> 32
        "w1e": lin(ks[0], NODE_FEATURES, EMBED_HIDDEN),
        "b1e": jax.random.normal(ks[1], (1, EMBED_HIDDEN), jnp.float32) * 0.1,
        "w2e": lin(ks[2], EMBED_HIDDEN, EMBED_OUT),
        "b2e": jax.random.normal(ks[3], (1, EMBED_OUT), jnp.float32) * 0.1,
        # GCN1, GCN2: 32 -> 32
        "wg1": lin(ks[4], EMBED_OUT, EMBED_OUT),
        "bg1": jax.random.normal(ks[5], (1, EMBED_OUT), jnp.float32) * 0.1,
        "wg2": lin(ks[6], EMBED_OUT, EMBED_OUT),
        "bg2": jax.random.normal(ks[7], (1, EMBED_OUT), jnp.float32) * 0.1,
        # MLP_pred: 32 -> 32 -> 1
        "w1p": lin(ks[8], EMBED_OUT, PRED_HIDDEN),
        "b1p": jax.random.normal(ks[9], (1, PRED_HIDDEN), jnp.float32) * 0.1,
        "w2p": lin(ks[10], PRED_HIDDEN, OUT_DIM),
        "b2p": jax.random.normal(ks[11], (1, OUT_DIM), jnp.float32) * 0.1,
    }


if __name__ == "__main__":
    key = jax.random.PRNGKey(0)
    k_x, k_p, k_params = jax.random.split(key, 3)

    T = 16   # timesteps (batched into the matmul lane axis)
    N = 16   # graph nodes per timestep

    x = jax.random.normal(k_x, (T, N, NODE_FEATURES), jnp.float32)
    priors = jax.random.normal(k_p, (T, N, OUT_DIM), jnp.float32)

    # Deterministic ring graph, edges in both directions: edge_index [2, 2N]
    idx = jnp.arange(N, dtype=jnp.int32)
    nxt = (idx + 1) % N
    edge_index = jnp.stack(
        [jnp.concatenate([idx, nxt]), jnp.concatenate([nxt, idx])], axis=0
    )
    a_norm = build_gcn_norm_adj(edge_index, N)
    params = init_params(k_params)

    # static, chip-dependent choices + one-time packing (outside the hot path)
    tile_m = pick_tile_m(T, N)
    act_dtype = pick_act_dtype()
    a_blockT, w_pack, b_pack = prepare_inputs(params, a_norm, tile_m, N)
    a_blockT = jax.block_until_ready(a_blockT)

    out = temporal_skip(x, priors, a_blockT, w_pack, b_pack,
                        tile_m=tile_m, act_dtype=act_dtype)
    out = jax.block_until_ready(out)

    assert out.shape == (T, N, OUT_DIM), out.shape
    assert out.dtype == jnp.float32
    assert bool(jnp.all(jnp.isfinite(out)))

    ref = temporal_skip_ref(x, a_norm, priors, params)
    max_err = float(jnp.max(jnp.abs(out - ref)))
    assert max_err < 1e-1, f"mismatch vs f32 reference: {max_err}"

    print("KERNEL_OK")
</pallas_src>

<mosaic_0001>
module attributes {stable_mosaic.version = 11 : i64} {
  func.func @temporal_skip_kernel(%arg0: i32, %arg1: memref<48x256xbf16, #tpu.memory_space<vmem>>, %arg2: memref<1x256xf32, #tpu.memory_space<vmem>>, %arg3: memref<256x256xbf16, #tpu.memory_space<vmem>>, %arg4: memref<192x64xbf16, #tpu.memory_space<vmem>>, %arg5: memref<64x8xf32, #tpu.memory_space<vmem>>, %arg6: memref<1x256xf32, #tpu.memory_space<vmem>>) attributes {dimension_semantics = [#tpu.dimension_semantics<parallel>], iteration_bounds = array<i64: 1>, scalar_prefetch = 0 : i64, scratch_operands = 0 : i64, tpu.core_type = #tpu.core_type<tc>, window_params = [{transform_indices = @transform_0, window_bounds = array<i64: 48, 256>}, {transform_indices = @transform_1, window_bounds = array<i64: 1, 256>}, {pipeline_mode = #tpu.pipeline_mode<synchronous>, transform_indices = @transform_2, window_bounds = array<i64: 256, 256>}, {pipeline_mode = #tpu.pipeline_mode<synchronous>, transform_indices = @transform_3, window_bounds = array<i64: 192, 64>}, {pipeline_mode = #tpu.pipeline_mode<synchronous>, transform_indices = @transform_4, window_bounds = array<i64: 64, 8>}, {transform_indices = @transform_5, window_bounds = array<i64: 1, 256>}]} {
    %c0 = arith.constant 0 : index
    %c0_0 = arith.constant 0 : index
    %0 = vector.load %arg1[%c0, %c0_0] : memref<48x256xbf16, #tpu.memory_space<vmem>>, vector<48x256xbf16>
    %c0_1 = arith.constant 0 : index
    %c0_2 = arith.constant 0 : index
    %1 = vector.load %arg3[%c0_1, %c0_2] : memref<256x256xbf16, #tpu.memory_space<vmem>>, vector<256x256xbf16>
    %c0_3 = arith.constant 0 : index
    %c0_4 = arith.constant 0 : index
    %2 = vector.load %arg4[%c0_3, %c0_4] : memref<192x64xbf16, #tpu.memory_space<vmem>>, vector<64x48xbf16>
    %c64 = arith.constant 64 : index
    %c0_5 = arith.constant 0 : index
    %3 = vector.load %arg4[%c64, %c0_5] : memref<192x64xbf16, #tpu.memory_space<vmem>>, vector<32x64xbf16>
    %c96 = arith.constant 96 : index
    %c0_6 = arith.constant 0 : index
    %4 = vector.load %arg4[%c96, %c0_6] : memref<192x64xbf16, #tpu.memory_space<vmem>>, vector<32x32xbf16>
    %c128 = arith.constant 128 : index
    %c0_7 = arith.constant 0 : index
    %5 = vector.load %arg4[%c128, %c0_7] : memref<192x64xbf16, #tpu.memory_space<vmem>>, vector<32x32xbf16>
    %c160 = arith.constant 160 : index
    %c0_8 = arith.constant 0 : index
    %6 = vector.load %arg4[%c160, %c0_8] : memref<192x64xbf16, #tpu.memory_space<vmem>>, vector<32x32xbf16>
    %c0_9 = arith.constant 0 : index
    %c0_10 = arith.constant 0 : index
    %7 = vector.load %arg5[%c0_9, %c0_10] : memref<64x8xf32, #tpu.memory_space<vmem>>, vector<64x1xf32>
    %c0_11 = arith.constant 0 : index
    %c1 = arith.constant 1 : index
    %8 = vector.load %arg5[%c0_11, %c1] : memref<64x8xf32, #tpu.memory_space<vmem>>, vector<32x1xf32>
    %c0_12 = arith.constant 0 : index
    %c2 = arith.constant 2 : index
    %9 = vector.load %arg5[%c0_12, %c2] : memref<64x8xf32, #tpu.memory_space<vmem>>, vector<32x1xf32>
    %c0_13 = arith.constant 0 : index
    %c3 = arith.constant 3 : index
    %10 = vector.load %arg5[%c0_13, %c3] : memref<64x8xf32, #tpu.memory_space<vmem>>, vector<32x1xf32>
    %c0_14 = arith.constant 0 : index
    %c4 = arith.constant 4 : index
    %11 = vector.load %arg5[%c0_14, %c4] : memref<64x8xf32, #tpu.memory_space<vmem>>, vector<32x1xf32>
    %c0_15 = arith.constant 0 : index
    %c5 = arith.constant 5 : index
    %12 = vector.load %arg5[%c0_15, %c5] : memref<64x8xf32, #tpu.memory_space<vmem>>, vector<32x1xf32>
    %c0_16 = arith.constant 0 : index
    %c6 = arith.constant 6 : index
    %13 = vector.load %arg5[%c0_16, %c6] : memref<64x8xf32, #tpu.memory_space<vmem>>, vector<1x1xf32>
    %cst = arith.constant dense<0.000000e+00> : vector<64x256xf32>
    %14 = tpu.matmul %2, %0, %cst {dimension_numbers = #tpu.dot_dimension_numbers<[1], [0], [0], [1], [0, 0, 1, 1], [], []>} : vector<64x48xbf16>, vector<48x256xbf16>, vector<64x256xf32> -> vector<64x256xf32>
    %15 = vector.broadcast %7 : vector<64x1xf32> to vector<64x256xf32>
    %16 = arith.addf %14, %15 : vector<64x256xf32>
    %17 = math.tanh %16 : vector<64x256xf32>
    %18 = arith.truncf %17 : vector<64x256xf32> to vector<64x256xbf16>
    %cst_17 = arith.constant dense<0.000000e+00> : vector<32x256xf32>
    %19 = tpu.matmul %3, %18, %cst_17 {dimension_numbers = #tpu.dot_dimension_numbers<[1], [0], [0], [1], [0, 0, 1, 1], [], []>} : vector<32x64xbf16>, vector<64x256xbf16>, vector<32x256xf32> -> vector<32x256xf32>
    %20 = vector.broadcast %8 : vector<32x1xf32> to vector<32x256xf32>
    %21 = arith.addf %19, %20 : vector<32x256xf32>
    %22 = math.tanh %21 : vector<32x256xf32>
    %23 = arith.truncf %22 : vector<32x256xf32> to vector<32x256xbf16>
    %cst_18 = arith.constant dense<0.000000e+00> : vector<32x256xf32>
    %24 = tpu.matmul %4, %23, %cst_18 {dimension_numbers = #tpu.dot_dimension_numbers<[1], [0], [0], [1], [0, 0, 1, 1], [], []>} : vector<32x32xbf16>, vector<32x256xbf16>, vector<32x256xf32> -> vector<32x256xf32>
    %25 = arith.truncf %24 : vector<32x256xf32> to vector<32x256xbf16>
    %cst_19 = arith.constant dense<0.000000e+00> : vector<32x256xf32>
    %26 = tpu.matmul %25, %1, %cst_19 {dimension_numbers = #tpu.dot_dimension_numbers<[1], [0], [0], [1], [0, 0, 1, 1], [], []>} : vector<32x256xbf16>, vector<256x256xbf16>, vector<32x256xf32> -> vector<32x256xf32>
    %27 = vector.broadcast %9 : vector<32x1xf32> to vector<32x256xf32>
    %28 = arith.addf %26, %27 : vector<32x256xf32>
    %cst_20 = arith.constant 0.000000e+00 : f32
    %29 = vector.broadcast %cst_20 : f32 to vector<32x256xf32>
    %30 = arith.maximumf %28, %29 : vector<32x256xf32>
    %31 = arith.truncf %30 : vector<32x256xf32> to vector<32x256xbf16>
    %cst_21 = arith.constant dense<0.000000e+00> : vector<32x256xf32>
    %32 = tpu.matmul %5, %31, %cst_21 {dimension_numbers = #tpu.dot_dimension_numbers<[1], [0], [0], [1], [0, 0, 1, 1], [], []>} : vector<32x32xbf16>, vector<32x256xbf16>, vector<32x256xf32> -> vector<32x256xf32>
    %33 = arith.truncf %32 : vector<32x256xf32> to vector<32x256xbf16>
    %cst_22 = arith.constant dense<0.000000e+00> : vector<32x256xf32>
    %34 = tpu.matmul %33, %1, %cst_22 {dimension_numbers = #tpu.dot_dimension_numbers<[1], [0], [0], [1], [0, 0, 1, 1], [], []>} : vector<32x256xbf16>, vector<256x256xbf16>, vector<32x256xf32> -> vector<32x256xf32>
    %35 = vector.broadcast %10 : vector<32x1xf32> to vector<32x256xf32>
    %36 = arith.addf %34, %35 : vector<32x256xf32>
    %cst_23 = arith.constant 0.000000e+00 : f32
    %37 = vector.broadcast %cst_23 : f32 to vector<32x256xf32>
    %38 = arith.maximumf %36, %37 : vector<32x256xf32>
    %39 = arith.truncf %38 : vector<32x256xf32> to vector<32x256xbf16>
    %cst_24 = arith.constant dense<0.000000e+00> : vector<32x256xf32>
    %40 = tpu.matmul %6, %39, %cst_24 {dimension_numbers = #tpu.dot_dimension_numbers<[1], [0], [0], [1], [0, 0, 1, 1], [], []>} : vector<32x32xbf16>, vector<32x256xbf16>, vector<32x256xf32> -> vector<32x256xf32>
    %41 = vector.broadcast %11 : vector<32x1xf32> to vector<32x256xf32>
    %42 = arith.addf %40, %41 : vector<32x256xf32>
    %43 = math.tanh %42 : vector<32x256xf32>
    %44 = vector.broadcast %12 : vector<32x1xf32> to vector<32x256xf32>
    %45 = arith.mulf %43, %44 : vector<32x256xf32>
    %cst_25 = arith.constant dense<0.000000e+00> : vector<256xf32>
    %46 = vector.multi_reduction <add>, %45, %cst_25 [0] : vector<32x256xf32> to vector<256xf32>
    %47 = vector.shape_cast %46 : vector<256xf32> to vector<1x256xf32>
    %48 = vector.broadcast %13 : vector<1x1xf32> to vector<1x256xf32>
    %49 = arith.addf %47, %48 : vector<1x256xf32>
    %50 = math.tanh %49 : vector<1x256xf32>
    %c0_26 = arith.constant 0 : index
    %c0_27 = arith.constant 0 : index
    %51 = vector.load %arg2[%c0_26, %c0_27] : memref<1x256xf32, #tpu.memory_space<vmem>>, vector<1x256xf32>
    %52 = arith.addf %50, %51 : vector<1x256xf32>
    %c0_28 = arith.constant 0 : index
    %c0_29 = arith.constant 0 : index
    %53 = vector.load %arg6[%c0_28, %c0_29] : memref<1x256xf32, #tpu.memory_space<vmem>>, vector<1x256xf32>
    tpu.vector_store %arg6[%c0_28, %c0_29], %52 {strides = array<i32>} : memref<1x256xf32, #tpu.memory_space<vmem>>, vector<1x256xf32>,
    return
  }
  func.func @transform_0(%arg0: i32) -> (i32, i32) {
    %c0_i32 = arith.constant 0 : i32
    %c0_i32_0 = arith.constant 0 : i32
    return %c0_i32, %arg0 : i32, i32
  }
  func.func @transform_1(%arg0: i32) -> (i32, i32) {
    %c0_i32 = arith.constant 0 : i32
    %c0_i32_0 = arith.constant 0 : i32
    return %c0_i32, %arg0 : i32, i32
  }
  func.func @transform_2(%arg0: i32) -> (i32, i32) {
    %c0_i32 = arith.constant 0 : i32
    %c0_i32_0 = arith.constant 0 : i32
    %c0_i32_1 = arith.constant 0 : i32
    return %c0_i32, %c0_i32_0 : i32, i32
  }
  func.func @transform_3(%arg0: i32) -> (i32, i32) {
    %c0_i32 = arith.constant 0 : i32
    %c0_i32_0 = arith.constant 0 : i32
    %c0_i32_1 = arith.constant 0 : i32
    return %c0_i32, %c0_i32_0 : i32, i32
  }
  func.func @transform_4(%arg0: i32) -> (i32, i32) {
    %c0_i32 = arith.constant 0 : i32
    %c0_i32_0 = arith.constant 0 : i32
    %c0_i32_1 = arith.constant 0 : i32
    return %c0_i32, %c0_i32_0 : i32, i32
  }
  func.func @transform_5(%arg0: i32) -> (i32, i32) {
    %c0_i32 = arith.constant 0 : i32
    %c0_i32_0 = arith.constant 0 : i32
    return %c0_i32, %arg0 : i32, i32
  }
}

</mosaic_0001>

<bundles_post_ra>
// kernel: temporal_skip.1
= control target key start
LH: loop header
LB: loop body
LE: loop exit
PB: predicated region body
PF: predicated region fallthrough
CT: control target
= control target key end

     0   :  { %v1269_v1 = vmov 0   ;;  %vm182_vm0 = vcmask 392192   ;;  %v1270_v19 = vmov 1   ;;  %vm318_vm1 = vcmask 523264   ;;  %s1666_s0 = inlined_call_operand.vmem [shape: bf16[48,256], index: 0, kind: input, shape index: {}]   ;;  %s1667_s3 = inlined_call_operand.vmem [shape: bf16[192,64], index: 3, kind: input, shape index: {}]   ;;  %s1668_s4 = inlined_call_operand.vmem [shape: f32[64,8], index: 4, kind: input, shape index: {}]   ;;  %s1669_s2 = inlined_call_operand.vmem [shape: bf16[256,256], index: 2, kind: input, shape index: {}]   ;;  %s1670_s1 = inlined_call_operand.vmem [shape: f32[1,256], index: 1, kind: input, shape index: {}]   ;;  %s1671_s5 = inlined_call_operand.vmem [shape: f32[1,256], index: 5, kind: output, shape index: {}]  }
   0x1   :  { %v1132_v0 = vld [vmem:[%s1666_s0 + $0x4] ss:$8 sps:$4 sm:$0xff]   ;;  %227 = vmatprep.mubr.bf16.mxu0 %v1269_v1  ;;  %1118 = vset.pattern.permute.xlu0 %v1269_v1  ;;  %v1134_v2 = vld [vmem:[%s1666_s0] ss:$8 sps:$4 sm:$0xff]   ;;  %v1135_v3 = vld [vmem:[%s1666_s0 + $0x14] ss:$8 sps:$4 sm:$0xff]  }
   0x2   :  { %1119 = vset.pattern.permute.xlu1 %v1269_v1  ;;  %357 = vmatprep.mubr.bf16.mxu1 %v1269_v1  ;;  %v1137_v4 = vld [vmem:[%s1666_s0 + $0x10] ss:$8 sps:$4 sm:$0xff]   ;;  %v1138_v5 = vld [vmem:[%s1666_s0 + $0x24] ss:$8 sps:$4 sm:$0xff]   ;;  %v1140_v6 = vld [vmem:[%s1666_s0 + $0x20] ss:$8 sps:$4 sm:$0xff]  }
   0x3   :  { %195 = vmatprep.subr.bf16.mxu0 %v1132_v0  ;;  %v1332_v7 = vld [vmem:[%s1668_s4] sm:$0xff]  ;;  %v1337_v8 = vld [vmem:[%s1668_s4 + $0x10] sm:$0xff]  ;;  %v1347_v10 = vld [vmem:[%s1668_s4 + $0x8] sm:$0xff]  ;;  %vm400_vm2 = vcmask 261120  }
   0x4   :  { %196 = vmatpush1.bf16.msra.mxu0 %v1134_v2  ;;  %v1141_v9 = vld [vmem:[%s1667_s3] sm:$0xff]   ;;  %94 = vperm.xlu0 %1118, %v1332_v7   ;;  %v1352_v11 = vld [vmem:[%s1668_s4 + $0x18] sm:$0xff]  ;;  %v88_v13 = vld [vmem:[%s1668_s4 + $0x28] sm:$0xff] }
   0x5   :  { %197 = vmatprep.subr.bf16.mxu0 %v1135_v3  ;;  %104 = vperm.xlu1 %1119, %v1337_v8   ;;  %v87_v12 = vld [vmem:[%s1668_s4 + $0x20] sm:$0xff]  ;;  %v1142_v14 = vld [vmem:[%s1667_s3 + $0x8] sm:$0xff]   ;;  %v89_v15 = vld [vmem:[%s1668_s4 + $0x30] sm:$0xff] }
   0x6   :  { %v90_v16 = vld [vmem:[%s1668_s4 + $0x38] sm:$0xff]  ;;  %v1143_v17 = vld [vmem:[%s1667_s3 + $0x10] sm:$0xff]  }
   0x7   :  { %v1144_v18 = vld [vmem:[%s1667_s3 + $0x18] sm:$0xff]  }
   0x8   :  { %198 = vmatpush1.bf16.msra.mxu0 %v1137_v4  ;;  %99 = vperm.xlu0 %1118, %v1347_v10  }
   0x9   :  { %199 = vmatprep.subr.bf16.mxu0 %v1138_v5  ;;  %109 = vperm.xlu1 %1119, %v1352_v11  }
   0xc   :  { %200 = vmatpush1.bf16.msra.mxu0 %v1140_v6  ;;  %114 = vperm.xlu0 %1118, %v87_v12  }
   0xd   :  { %119 = vperm.xlu1 %1119, %v88_v13  }
   0xf   :  { %1054 = vmatmul.mubr.msk.bf16.vlgmr.msra.gmra.mrb[0].mxu0 %vm182_vm0, %v1141_v9 }
  0x10   :  { %237 = vmatprep.mubr.bf16.mxu0 %v1269_v1  ;;  %124 = vperm.xlu0 %1118, %v89_v15  }
  0x11   :  { %129 = vperm.xlu1 %1119, %v90_v16  }
  0x14   :  { %1120 = vset.pattern.permute.xlu0 %v1270_v19 }
  0x15   :  { %1121 = vset.pattern.permute.xlu1 %v1270_v19  ;;  %293 = vperm.xlu0 %1120, %v1332_v7  }
  0x16   :  { %297 = vperm.xlu1 %1121, %v1347_v10  }
  0x17   :  { %1055 = vmatmul.mubr.msk.bf16.gmra.mrb[4].mxu0 %vm182_vm0, %v1142_v14 }
  0x18   :  { %247 = vmatprep.mubr.bf16.mxu0 %v1269_v1 }
  0x19   :  { %305 = vperm.xlu0 %1120, %v1352_v11  }
  0x1a   :  { %301 = vperm.xlu1 %1121, %v1337_v8  }
  0x1f   :  { %1056 = vmatmul.mubr.msk.bf16.gmra.mrb[8].mxu0 %vm182_vm0, %v1143_v17 }
  0x20   :  { %257 = vmatprep.mubr.bf16.mxu0 %v1269_v1 }
  0x27   :  { %1057 = vmatmul.mubr.msk.bf16.gmra.mrb[12].mxu0 %vm182_vm0, %v1144_v18 }
  0x83   :  { %v95_v20 = vpop.permute.xlu0 %94 }
  0x84   :  { %v105_v29 = vpop.permute.xlu1 %104 }
  0x87   :  { %v100_v22 = vpop.permute.xlu0 %99 }
  0x88   :  { %v110_v34 = vpop.permute.xlu1 %109 }
  0x8b   :  { %v115_v44 = vpop.permute.xlu0 %114 }
  0x8c   :  { %v120_v50 = vpop.permute.xlu1 %119 }
  0x8f   :  { %v125_v60 = vpop.permute.xlu0 %124 }
  0x90   :  { %v130_v3 = vpop.permute.xlu1 %129 }
  0xe2   :  { %v229_v21 = vpop.f32.mrb[0].mxu0 }
  0xe3   :  { %v230_v23 = vadd.f32 %v229_v21, %v95_v20  ;;  %v231_v24 = vpop.f32.mrb[1].mxu0 }
  0xe4   :  { %v232_v25 = vadd.f32 %v231_v24, %v95_v20  ;;  %v233_v26 = vpop.f32.mrb[2].mxu0 }
  0xe5   :  { %1201 = vtanh.f32 %v230_v23  ;;  %v234_v27 = vadd.f32 %v233_v26, %v100_v22  ;;  %v235_v28 = vpop.f32.mrb[3].mxu0  ;;  %v1146_v26 = vld [vmem:[%s1667_s3 + $0x28] sm:$0xff]  }
  0xe6   :  { %1203 = vtanh.f32 %v232_v25  ;;  %v236_v30 = vadd.f32 %v235_v28, %v100_v22  ;;  %v1145_v25 = vld [vmem:[%s1667_s3 + $0x20] sm:$0xff]  }
  0xe7   :  { %1205 = vtanh.f32 %v234_v27  ;;  %v1399_v27 = vld [vmem:[%s1669_s2] ss:$8 sps:$4 sm:$0xff]   ;;  %v1404_v28 = vld [vmem:[%s1669_s2 + $0x4] ss:$8 sps:$4 sm:$0xff]  }
  0xe8   :  { %1207 = vtanh.f32 %v236_v30  ;;  %640 = vmatprep.subr.bf16.mxu0 %v1404_v28  ;;  %v1416_v30 = vld [vmem:[%s1669_s2 + $0x10] ss:$8 sps:$4 sm:$0xff]  }
  0xe9   :  { %641 = vmatpush1.bf16.msra.mxu0 %v1399_v27 }
  0xea   :  { %v239_v31 = vpop.f32.mrb[4].mxu0 }
  0xeb   :  { %v240_v32 = vadd.f32 %v239_v31, %v105_v29  ;;  %v241_v33 = vpop.f32.mrb[5].mxu0  ;;  %v1422_v31 = vld [vmem:[%s1669_s2 + $0x24] ss:$8 sps:$4 sm:$0xff]  }
  0xec   :  { %v242_v35 = vadd.f32 %v241_v33, %v105_v29  ;;  %v243_v36 = vpop.f32.mrb[6].mxu0  ;;  %v1409_v29 = vld [vmem:[%s1669_s2 + $0x14] ss:$8 sps:$4 sm:$0xff]  }
  0xed   :  { %1209 = vtanh.f32 %v240_v32  ;;  %v244_v37 = vadd.f32 %v243_v36, %v110_v34  ;;  %v245_v38 = vpop.f32.mrb[7].mxu0  ;;  %642 = vmatprep.subr.bf16.mxu0 %v1409_v29  ;;  %v1428_v32 = vld [vmem:[%s1669_s2 + $0x20] ss:$8 sps:$4 sm:$0xff]   ;;  %v1434_v33 = vld [vmem:[%s1669_s2 + $0x34] ss:$8 sps:$4 sm:$0xff]  }
  0xee   :  { %1211 = vtanh.f32 %v242_v35  ;;  %v246_v39 = vadd.f32 %v245_v38, %v110_v34  ;;  %643 = vmatpush1.bf16.msra.mxu0 %v1416_v30  ;;  %v1440_v34 = vld [vmem:[%s1669_s2 + $0x30] ss:$8 sps:$4 sm:$0xff]   ;;  %v1446_v35 = vld [vmem:[%s1669_s2 + $0x44] ss:$8 sps:$4 sm:$0xff]   ;;  %v1452_v36 = vld [vmem:[%s1669_s2 + $0x40] ss:$8 sps:$4 sm:$0xff]  }
  0xef   :  { %v1202_v40 = vpop.eup %1201  ;;  %1213 = vtanh.f32 %v244_v37  ;;  %644 = vmatprep.subr.bf16.mxu0 %v1422_v31  ;;  %v1458_v37 = vld [vmem:[%s1669_s2 + $0x54] ss:$8 sps:$4 sm:$0xff]   ;;  %v1464_v38 = vld [vmem:[%s1669_s2 + $0x50] ss:$8 sps:$4 sm:$0xff]  }
  0xf0   :  { %v1204_v41 = vpop.eup %1203  ;;  %1215 = vtanh.f32 %v246_v39  ;;  %v1470_v39 = vld [vmem:[%s1669_s2 + $0x64] ss:$8 sps:$4 sm:$0xff]  }
  0xf1   :  { %v1206_v42 = vpop.eup %1205 }
  0xf2   :  { %v1208_v43 = vpop.eup %1207  ;;  %v249_v45 = vpop.f32.mrb[8].mxu0  ;;  %v284_v46 = vpack.c.bf16 %v1206_v42, %v1202_v40  ;;  %645 = vmatpush1.bf16.msra.mxu0 %v1428_v32  ;;  %v1476_v40 = vld [vmem:[%s1669_s2 + $0x60] ss:$8 sps:$4 sm:$0xff]   ;;  %v1488_v42 = vld [vmem:[%s1669_s2 + $0x70] ss:$8 sps:$4 sm:$0xff]  }
  0xf3   :  { %v250_v47 = vadd.f32 %v249_v45, %v115_v44  ;;  %v251_v48 = vpop.f32.mrb[9].mxu0  ;;  %v285_v49 = vpack.c.bf16 %v1208_v43, %v1204_v41  ;;  %646 = vmatprep.subr.bf16.mxu0 %v1434_v33  ;;  %v1482_v41 = vld [vmem:[%s1669_s2 + $0x74] ss:$8 sps:$4 sm:$0xff]   ;;  %v1494_v43 = vld [vmem:[%s1669_s2 + $0x84] ss:$8 sps:$4 sm:$0xff]  }
  0xf4   :  { %v252_v51 = vadd.f32 %v251_v48, %v115_v44  ;;  %v253_v52 = vpop.f32.mrb[10].mxu0  ;;  %v1500_v44 = vld [vmem:[%s1669_s2 + $0x80] ss:$8 sps:$4 sm:$0xff]   ;;  %v1506_v45 = vld [vmem:[%s1669_s2 + $0x94] ss:$8 sps:$4 sm:$0xff]  }
  0xf5   :  { %1217 = vtanh.f32 %v250_v47  ;;  %v254_v53 = vadd.f32 %v253_v52, %v120_v50  ;;  %v255_v54 = vpop.f32.mrb[11].mxu0  ;;  %325 = vmatprep.subr.bf16.mxu1 %v285_v49  ;;  %v1518_v47 = vld [vmem:[%s1669_s2 + $0xa4] ss:$8 sps:$4 sm:$0xff]   ;;  %v1524_v48 = vld [vmem:[%s1669_s2 + $0xa0] ss:$8 sps:$4 sm:$0xff]  }
  0xf6   :  { %1219 = vtanh.f32 %v252_v51  ;;  %v256_v55 = vadd.f32 %v255_v54, %v120_v50  ;;  %326 = vmatpush1.bf16.msra.mxu1 %v284_v46  ;;  %647 = vmatpush1.bf16.msra.mxu0 %v1440_v34  ;;  %v1512_v46 = vld [vmem:[%s1669_s2 + $0x90] ss:$8 sps:$4 sm:$0xff]   ;;  %v1530_v49 = vld [vmem:[%s1669_s2 + $0xb4] ss:$8 sps:$4 sm:$0xff]   ;;  %v1542_v51 = vld [vmem:[%s1669_s2 + $0xc4] ss:$8 sps:$4 sm:$0xff]  }
  0xf7   :  { %v1210_v56 = vpop.eup %1209  ;;  %1221 = vtanh.f32 %v254_v53  ;;  %648 = vmatprep.subr.bf16.mxu0 %v1446_v35  ;;  %v1536_v50 = vld [vmem:[%s1669_s2 + $0xb0] ss:$8 sps:$4 sm:$0xff]   ;;  %v1548_v52 = vld [vmem:[%s1669_s2 + $0xc0] ss:$8 sps:$4 sm:$0xff]   ;;  %v1554_v53 = vld [vmem:[%s1669_s2 + $0xd4] ss:$8 sps:$4 sm:$0xff]  }
  0xf8   :  { %v1212_v57 = vpop.eup %1211  ;;  %1223 = vtanh.f32 %v256_v55  ;;  %v1560_v54 = vld [vmem:[%s1669_s2 + $0xd0] ss:$8 sps:$4 sm:$0xff]   ;;  %v1566_v55 = vld [vmem:[%s1669_s2 + $0xe4] ss:$8 sps:$4 sm:$0xff]  }
  0xf9   :  { %v1214_v58 = vpop.eup %1213 }
  0xfa   :  { %v1216_v59 = vpop.eup %1215  ;;  %v259_v61 = vpop.f32.mrb[12].mxu0  ;;  %v286_v62 = vpack.c.bf16 %v1214_v58, %v1210_v56  ;;  %649 = vmatpush1.bf16.msra.mxu0 %v1452_v36  ;;  %v1572_v56 = vld [vmem:[%s1669_s2 + $0xe0] ss:$8 sps:$4 sm:$0xff]  }
  0xfb   :  { %v260_v63 = vadd.f32 %v259_v61, %v125_v60  ;;  %v261_v0 = vpop.f32.mrb[13].mxu0  ;;  %v287_v2 = vpack.c.bf16 %v1216_v59, %v1212_v57  ;;  %650 = vmatprep.subr.bf16.mxu0 %v1458_v37  ;;  %v294_v57 = vpop.permute.xlu0 %293 }
  0xfc   :  { %v262_v4 = vadd.f32 %v261_v0, %v125_v60  ;;  %v263_v5 = vpop.f32.mrb[14].mxu0  ;;  %v298_v58 = vpop.permute.xlu1 %297 }
  0xfd   :  { %1225 = vtanh.f32 %v260_v63  ;;  %v264_v6 = vadd.f32 %v263_v5, %v130_v3  ;;  %v265_v9 = vpop.f32.mrb[15].mxu0  ;;  %327 = vmatprep.subr.bf16.mxu1 %v287_v2 }
  0xfe   :  { %1227 = vtanh.f32 %v262_v4  ;;  %v266_v12 = vadd.f32 %v265_v9, %v130_v3  ;;  %328 = vmatpush1.bf16.msra.mxu1 %v286_v62  ;;  %651 = vmatpush1.bf16.msra.mxu0 %v1464_v38 }
  0xff   :  { %v1218_v13 = vpop.eup %1217  ;;  %1229 = vtanh.f32 %v264_v6  ;;  %652 = vmatprep.subr.bf16.mxu0 %v1470_v39 }
 0x100   :  { %v1220_v14 = vpop.eup %1219  ;;  %1231 = vtanh.f32 %v266_v12  ;;  %v302_v4 = vpop.permute.xlu1 %301 }
 0x101   :  { %v1222_v15 = vpop.eup %1221  ;;  %v306_v12 = vpop.permute.xlu0 %305 }
 0x102   :  { %v1224_v16 = vpop.eup %1223  ;;  %v288_v17 = vpack.c.bf16 %v1222_v15, %v1218_v13  ;;  %653 = vmatpush1.bf16.msra.mxu0 %v1476_v40 }
 0x103   :  { %v289_v18 = vpack.c.bf16 %v1224_v16, %v1220_v14  ;;  %654 = vmatprep.subr.bf16.mxu0 %v1482_v41 }
 0x105   :  { %329 = vmatprep.subr.bf16.mxu1 %v289_v18 }
 0x106   :  { %330 = vmatpush1.bf16.msra.mxu1 %v288_v17  ;;  %655 = vmatpush1.bf16.msra.mxu0 %v1488_v42 }
 0x107   :  { %v1226_v19 = vpop.eup %1225  ;;  %656 = vmatprep.subr.bf16.mxu0 %v1494_v43 }
 0x108   :  { %v1228_v20 = vpop.eup %1227 }
 0x109   :  { %v1230_v21 = vpop.eup %1229 }
 0x10a   :  { %v1232_v22 = vpop.eup %1231  ;;  %v290_v23 = vpack.c.bf16 %v1230_v21, %v1226_v19  ;;  %657 = vmatpush1.bf16.msra.mxu0 %v1500_v44 }
 0x10b   :  { %v291_v24 = vpack.c.bf16 %v1232_v22, %v1228_v20  ;;  %658 = vmatprep.subr.bf16.mxu0 %v1506_v45 }
 0x10d   :  { %331 = vmatprep.subr.bf16.mxu1 %v291_v24 }
 0x10e   :  { %332 = vmatpush1.bf16.msra.mxu1 %v290_v23  ;;  %659 = vmatpush1.bf16.msra.mxu0 %v1512_v46 }
 0x10f   :  { %660 = vmatprep.subr.bf16.mxu0 %v1518_v47 }
 0x111   :  { %1060 = vmatmul.mubr.msk.bf16.vlgmr.msra.gmra.mrb[0].mxu1 %vm318_vm1, %v1145_v25 }
 0x112   :  { %367 = vmatprep.mubr.bf16.mxu1 %v1269_v1  ;;  %661 = vmatpush1.bf16.msra.mxu0 %v1524_v48 }
 0x113   :  { %662 = vmatprep.subr.bf16.mxu0 %v1530_v49 }
 0x116   :  { %663 = vmatpush1.bf16.msra.mxu0 %v1536_v50 }
 0x117   :  { %664 = vmatprep.subr.bf16.mxu0 %v1542_v51 }
 0x119   :  { %1061 = vmatmul.mubr.msk.bf16.gmra.mrb[4].mxu1 %vm318_vm1, %v1146_v26 }
 0x11a   :  { %439 = vmatprep.mubr.bf16.mxu1 %v1269_v1  ;;  %665 = vmatpush1.bf16.msra.mxu0 %v1548_v52 }
 0x11b   :  { %666 = vmatprep.subr.bf16.mxu0 %v1554_v53 }
 0x11e   :  { %667 = vmatpush1.bf16.msra.mxu0 %v1560_v54 }
 0x11f   :  { %668 = vmatprep.subr.bf16.mxu0 %v1566_v55 }
 0x122   :  { %669 = vmatpush1.bf16.msra.mxu0 %v1572_v56 }
 0x1e4   :  { %v359_v59 = vpop.f32.mrb[0].mxu1 }
 0x1e5   :  { %v360_v60 = vadd.f32 %v359_v59, %v294_v57  ;;  %v361_v61 = vpop.f32.mrb[1].mxu1 }
 0x1e6   :  { %v362_v62 = vadd.f32 %v361_v61, %v294_v57  ;;  %v363_v63 = vpop.f32.mrb[2].mxu1  ;;  %v1148_v61 = vld [vmem:[%s1667_s3 + $0x38] sm:$0xff]  }
 0x1e7   :  { %1233 = vtanh.f32 %v360_v60  ;;  %v364_v0 = vadd.f32 %v363_v63, %v298_v58  ;;  %v365_v2 = vpop.f32.mrb[3].mxu1  ;;  %v1147_v60 = vld [vmem:[%s1667_s3 + $0x30] sm:$0xff]  }
 0x1e8   :  { %1235 = vtanh.f32 %v362_v62  ;;  %v366_v3 = vadd.f32 %v365_v2, %v298_v58 }
 0x1e9   :  { %1237 = vtanh.f32 %v364_v0 }
 0x1ea   :  { %1239 = vtanh.f32 %v366_v3 }
 0x1ec   :  { %v369_v5 = vpop.f32.mrb[4].mxu1 }
 0x1ed   :  { %v370_v6 = vadd.f32 %v369_v5, %v302_v4  ;;  %v371_v9 = vpop.f32.mrb[5].mxu1 }
 0x1ee   :  { %v372_v13 = vadd.f32 %v371_v9, %v302_v4  ;;  %v373_v14 = vpop.f32.mrb[6].mxu1 }
 0x1ef   :  { %1241 = vtanh.f32 %v370_v6  ;;  %v374_v15 = vadd.f32 %v373_v14, %v306_v12  ;;  %v375_v16 = vpop.f32.mrb[7].mxu1 }
 0x1f0   :  { %1243 = vtanh.f32 %v372_v13  ;;  %v376_v17 = vadd.f32 %v375_v16, %v306_v12 }
 0x1f1   :  { %v1234_v18 = vpop.eup %1233  ;;  %1245 = vtanh.f32 %v374_v15 }
 0x1f2   :  { %v1236_v19 = vpop.eup %1235  ;;  %1247 = vtanh.f32 %v376_v17 }
 0x1f3   :  { %v1238_v20 = vpop.eup %1237 }
 0x1f4   :  { %v1240_v21 = vpop.eup %1239  ;;  %v386_v22 = vpack.c.bf16 %v1238_v20, %v1234_v18  ;;  %v1197_v20 = vld [vmem:[%s1667_s3 + $0x40] sm:$0xff]  }
 0x1f5   :  { %v387_v23 = vpack.c.bf16 %v1240_v21, %v1236_v19  ;;  %v1198_v21 = vld [vmem:[%s1667_s3 + $0x48] sm:$0xff]  }
 0x1f7   :  { %407 = vmatprep.subr.bf16.mxu1 %v387_v23 }
 0x1f8   :  { %408 = vmatpush1.bf16.msra.mxu1 %v386_v22  ;;  %v1272_v22 = vmov 3  }
 0x1f9   :  { %v1242_v24 = vpop.eup %1241 }
 0x1fa   :  { %v1244_v25 = vpop.eup %1243 }
 0x1fb   :  { %v1246_v26 = vpop.eup %1245 }
 0x1fc   :  { %v1248_v57 = vpop.eup %1247  ;;  %v388_v58 = vpack.c.bf16 %v1246_v26, %v1242_v24 }
 0x1fd   :  { %v389_v59 = vpack.c.bf16 %v1248_v57, %v1244_v25 }
 0x1ff   :  { %409 = vmatprep.subr.bf16.mxu1 %v389_v59 }
 0x200   :  { %410 = vmatpush1.bf16.msra.mxu1 %v388_v58 }
 0x201   :  { %794 = vmatprep.subr.bf16.mxu1 %v1404_v28  ;;  %v1194_v28 = vld [vmem:[%s1669_s2 + $0xf0] ss:$8 sps:$4 sm:$0xff]  }
 0x203   :  { %1064 = vmatmul.mubr.msk.bf16.vlgmr.msra.gmra.mrb[8].mxu1 %vm400_vm2, %v1147_v60 }
 0x204   :  { %449 = vmatprep.mubr.bf16.mxu1 %v1269_v1  ;;  %795 = vmatpush1.bf16.msra.mxu1 %v1399_v27  ;;  %v1196_v27 = vld [vmem:[%s1669_s2 + $0xf4] ss:$8 sps:$4 sm:$0xff]  }
 0x205   :  { %796 = vmatprep.subr.bf16.mxu1 %v1409_v29  ;;  %670 = vmatprep.subr.bf16.mxu0 %v1196_v27  ;;  %v1271_v29 = vmov 2  }
 0x206   :  { %671 = vmatpush1.bf16.msra.mxu0 %v1194_v28  ;;  %1122 = vset.pattern.permute.xlu1 %v1271_v29 }
 0x207   :  { %1123 = vset.pattern.permute.xlu0 %v1271_v29  ;;  %465 = vperm.xlu1 %1122, %v1332_v7  }
 0x208   :  { %797 = vmatpush1.bf16.msra.mxu1 %v1416_v30  ;;  %469 = vperm.xlu0 %1123, %v1347_v10  }
 0x209   :  { %798 = vmatprep.subr.bf16.mxu1 %v1422_v31 }
 0x20b   :  { %1065 = vmatmul.mubr.msk.bf16.gmra.mrb[12].mxu1 %vm400_vm2, %v1148_v61  ;;  %473 = vperm.xlu1 %1122, %v1337_v8  }
 0x20c   :  { %799 = vmatpush1.bf16.msra.mxu1 %v1428_v32  ;;  %1124 = vset.pattern.permute.xlu0 %v1272_v22 }
 0x20d   :  { %800 = vmatprep.subr.bf16.mxu1 %v1434_v33  ;;  %779 = vperm.xlu0 %1124, %v1332_v7  }
 0x20f   :  { %477 = vperm.xlu1 %1122, %v1352_v11  }
 0x210   :  { %801 = vmatpush1.bf16.msra.mxu1 %v1440_v34 }
 0x211   :  { %802 = vmatprep.subr.bf16.mxu1 %v1446_v35  ;;  %791 = vperm.xlu0 %1124, %v1352_v11  }
 0x213   :  { %1125 = vset.pattern.permute.xlu1 %v1272_v22 }
 0x214   :  { %803 = vmatpush1.bf16.msra.mxu1 %v1452_v36  ;;  %783 = vperm.xlu1 %1125, %v1347_v10  }
 0x215   :  { %804 = vmatprep.subr.bf16.mxu1 %v1458_v37 }
 0x218   :  { %805 = vmatpush1.bf16.msra.mxu1 %v1464_v38  ;;  %787 = vperm.xlu1 %1125, %v1337_v8  }
 0x219   :  { %806 = vmatprep.subr.bf16.mxu1 %v1470_v39 }
 0x21c   :  { %807 = vmatpush1.bf16.msra.mxu1 %v1476_v40 }
 0x21d   :  { %808 = vmatprep.subr.bf16.mxu1 %v1482_v41 }
 0x220   :  { %809 = vmatpush1.bf16.msra.mxu1 %v1488_v42 }
 0x221   :  { %810 = vmatprep.subr.bf16.mxu1 %v1494_v43 }
 0x224   :  { %811 = vmatpush1.bf16.msra.mxu1 %v1500_v44 }
 0x225   :  { %812 = vmatprep.subr.bf16.mxu1 %v1506_v45 }
 0x228   :  { %813 = vmatpush1.bf16.msra.mxu1 %v1512_v46 }
 0x229   :  { %814 = vmatprep.subr.bf16.mxu1 %v1518_v47 }
 0x22c   :  { %815 = vmatpush1.bf16.msra.mxu1 %v1524_v48 }
 0x22d   :  { %816 = vmatprep.subr.bf16.mxu1 %v1530_v49 }
 0x230   :  { %817 = vmatpush1.bf16.msra.mxu1 %v1536_v50 }
 0x231   :  { %818 = vmatprep.subr.bf16.mxu1 %v1542_v51 }
 0x234   :  { %819 = vmatpush1.bf16.msra.mxu1 %v1548_v52 }
 0x235   :  { %820 = vmatprep.subr.bf16.mxu1 %v1554_v53 }
 0x238   :  { %821 = vmatpush1.bf16.msra.mxu1 %v1560_v54 }
 0x239   :  { %822 = vmatprep.subr.bf16.mxu1 %v1566_v55 }
 0x23c   :  { %823 = vmatpush1.bf16.msra.mxu1 %v1572_v56 }
 0x23d   :  { %824 = vmatprep.subr.bf16.mxu1 %v1196_v27 }
 0x240   :  { %825 = vmatpush1.bf16.msra.mxu1 %v1194_v28 }
 0x286   :  { %v466_v42 = vpop.permute.xlu1 %465 }
 0x287   :  { %v470_v44 = vpop.permute.xlu0 %469 }
 0x28a   :  { %v474_v51 = vpop.permute.xlu1 %473 }
 0x28e   :  { %v478_v4 = vpop.permute.xlu1 %477 }
 0x2d6   :  { %v441_v30 = vpop.f32.mrb[8].mxu1 }
 0x2d7   :  { %v443_v31 = vpop.f32.mrb[9].mxu1 }
 0x2d8   :  { %v445_v32 = vpop.f32.mrb[10].mxu1 }
 0x2d9   :  { %v460_v33 = vpack.c.bf16 %v445_v32, %v441_v30  ;;  %v447_v34 = vpop.f32.mrb[11].mxu1  ;;  %v1273_v30 = vmov 4   ;;  %v91_v32 = vld [vmem:[%s1668_s4] sm:$0x1] }
 0x2da   :  { %v461_v35 = vpack.c.bf16 %v447_v34, %v443_v31  ;;  %1126 = vset.pattern.permute.xlu1 %v1273_v30  ;;  %1127 = vset.pattern.permute.xlu0 %v1273_v30  ;;  %v1274_v31 = vmov 5   ;;  %v784_v34 = vpop.permute.xlu1 %783 }
 0x2db   :  { %860 = vperm.xlu1 %1126, %v1332_v7   ;;  %864 = vperm.xlu0 %1127, %v1347_v10  }
 0x2dc   :  { %672 = vmatprep.mubr.bf16.mxu0 %v461_v35 }
 0x2dd   :  { %673 = vmatmul.mubr.bf16.vlgmr.msra.gmra.mrb[16].mxu0 %v460_v33  ;;  %v780_v33 = vpop.permute.xlu0 %779 }
 0x2de   :  { %v451_v36 = vpop.f32.mrb[12].mxu1 }
 0x2df   :  { %v453_v37 = vpop.f32.mrb[13].mxu1  ;;  %868 = vperm.xlu1 %1126, %v1337_v8   ;;  %1128 = vset.pattern.permute.xlu0 %v1274_v31 }
 0x2e0   :  { %v455_v38 = vpop.f32.mrb[14].mxu1  ;;  %953 = vperm.xlu0 %1128, %v1332_v7  }
 0x2e1   :  { %v462_v39 = vpack.c.bf16 %v455_v38, %v451_v36  ;;  %v457_v40 = vpop.f32.mrb[15].mxu1 }
 0x2e2   :  { %v463_v41 = vpack.c.bf16 %v457_v40, %v453_v37 }
 0x2e3   :  { %872 = vperm.xlu1 %1126, %v1352_v11  }
 0x2e4   :  { %682 = vmatprep.mubr.bf16.mxu0 %v463_v41  ;;  %965 = vperm.xlu0 %1128, %v1352_v11  }
 0x2e5   :  { %683 = vmatmul.mubr.bf16.gmra.mrb[20].mxu0 %v462_v39 }
 0x2e6   :  { %753 = vmatprep.mubr.bf16.mxu0 %v1269_v1 }
 0x2e7   :  { %1129 = vset.pattern.permute.xlu1 %v1274_v31 }
 0x2e8   :  { %957 = vperm.xlu1 %1129, %v1347_v10  }
 0x2ec   :  { %961 = vperm.xlu1 %1129, %v1337_v8   ;;  %v788_v8 = vpop.permute.xlu1 %787 }
 0x3b0   :  { %v674_v43 = vpop.f32.mrb[16].mxu0 }
 0x3b1   :  { %v675_v45 = vadd.f32 %v674_v43, %v466_v42  ;;  %v676_v46 = vpop.f32.mrb[17].mxu0 }
 0x3b2   :  { %v677_v47 = vadd.f32 %v676_v46, %v466_v42  ;;  %v678_v48 = vpop.f32.mrb[18].mxu0 }
 0x3b3   :  { %v679_v49 = vadd.f32 %v678_v48, %v470_v44  ;;  %v680_v50 = vpop.f32.mrb[19].mxu0  ;;  %v693_v53 = vmax.f32 %v675_v45, 0.0 }
 0x3b4   :  { %v681_v52 = vadd.f32 %v680_v50, %v470_v44  ;;  %v694_v55 = vmax.f32 %v677_v47, 0.0 }
 0x3b5   :  { %v695_v54 = vmax.f32 %v679_v49, 0.0  ;;  %v792_v49 = vpop.permute.xlu0 %791 }
 0x3b6   :  { %v696_v56 = vmax.f32 %v681_v52, 0.0 }
 0x3b7   :  { %v701_v62 = vpack.c.bf16 %v695_v54, %v693_v53 }
 0x3b8   :  { %v702_v63 = vpack.c.bf16 %v696_v56, %v694_v55  ;;  %v684_v0 = vpop.f32.mrb[20].mxu0 }
 0x3b9   :  { %v685_v2 = vadd.f32 %v684_v0, %v474_v51  ;;  %v686_v3 = vpop.f32.mrb[21].mxu0 }
 0x3ba   :  { %v687_v5 = vadd.f32 %v686_v3, %v474_v51  ;;  %v688_v6 = vpop.f32.mrb[22].mxu0  ;;  %721 = vmatprep.subr.bf16.mxu0 %v702_v63  ;;  %v1199_v3 = vld [vmem:[%s1667_s3 + $0x50] sm:$0xff]  }
 0x3bb   :  { %v689_v9 = vadd.f32 %v688_v6, %v478_v4  ;;  %v690_v12 = vpop.f32.mrb[23].mxu0  ;;  %722 = vmatpush1.bf16.msra.mxu0 %v701_v62  ;;  %v697_v14 = vmax.f32 %v685_v2, 0.0 }
 0x3bc   :  { %v691_v13 = vadd.f32 %v690_v12, %v478_v4  ;;  %v698_v16 = vmax.f32 %v687_v5, 0.0  ;;  %v1200_v4 = vld [vmem:[%s1667_s3 + $0x58] sm:$0xff]   ;;  %v861_v5 = vpop.permute.xlu1 %860 }
 0x3bd   :  { %v699_v15 = vmax.f32 %v689_v9, 0.0  ;;  %v865_v9 = vpop.permute.xlu0 %864 }
 0x3be   :  { %v700_v17 = vmax.f32 %v691_v13, 0.0 }
 0x3bf   :  { %v703_v18 = vpack.c.bf16 %v699_v15, %v697_v14 }
 0x3c0   :  { %v704_v19 = vpack.c.bf16 %v700_v17, %v698_v16  ;;  %v869_v6 = vpop.permute.xlu1 %868 }
 0x3c2   :  { %723 = vmatprep.subr.bf16.mxu0 %v704_v19 }
 0x3c3   :  { %724 = vmatpush1.bf16.msra.mxu0 %v703_v18 }
 0x3c6   :  { %1100 = vmatmul.mubr.msk.bf16.vlgmr.msra.gmra.mrb[24].mxu0 %vm400_vm2, %v1197_v20 }
 0x3c7   :  { %763 = vmatprep.mubr.bf16.mxu0 %v1269_v1 }
 0x3ce   :  { %1101 = vmatmul.mubr.msk.bf16.gmra.mrb[28].mxu0 %vm400_vm2, %v1198_v21 }
 0x3cf   :  { %923 = vmatprep.mubr.bf16.mxu0 %v1269_v1 }
 0x499   :  { %v755_v23 = vpop.f32.mrb[24].mxu0 }
 0x49a   :  { %v757_v24 = vpop.f32.mrb[25].mxu0 }
 0x49b   :  { %v759_v25 = vpop.f32.mrb[26].mxu0 }
 0x49c   :  { %v774_v26 = vpack.c.bf16 %v759_v25, %v755_v23  ;;  %v761_v57 = vpop.f32.mrb[27].mxu0 }
 0x49d   :  { %v775_v58 = vpack.c.bf16 %v761_v57, %v757_v24 }
 0x49f   :  { %826 = vmatprep.mubr.bf16.mxu1 %v775_v58 }
 0x4a0   :  { %827 = vmatmul.mubr.bf16.vlgmr.msra.gmra.mrb[16].mxu1 %v774_v26  ;;  %v873_v26 = vpop.permute.xlu1 %872 }
 0x4a1   :  { %v765_v59 = vpop.f32.mrb[28].mxu0 }
 0x4a2   :  { %v767_v60 = vpop.f32.mrb[29].mxu0 }
 0x4a3   :  { %v769_v61 = vpop.f32.mrb[30].mxu0 }
 0x4a4   :  { %v776_v27 = vpack.c.bf16 %v769_v61, %v765_v59  ;;  %v771_v28 = vpop.f32.mrb[31].mxu0  ;;  %v958_v59 = vpop.permute.xlu1 %957 }
 0x4a5   :  { %v777_v29 = vpack.c.bf16 %v771_v28, %v767_v60  ;;  %v954_v60 = vpop.permute.xlu0 %953 }
 0x4a7   :  { %836 = vmatprep.mubr.bf16.mxu1 %v777_v29 }
 0x4a8   :  { %837 = vmatmul.mubr.bf16.gmra.mrb[20].mxu1 %v776_v27  ;;  %v962_v30 = vpop.permute.xlu1 %961 }
 0x4a9   :  { %933 = vmatprep.mubr.bf16.mxu1 %v1269_v1  ;;  %v1275_v1 = vmov 6  }
 0x4aa   :  { %1131 = vset.pattern.permute.xlu0 %v1275_v1  ;;  %1130 = vset.pattern.permute.xlu1 %v1275_v1 }
 0x4ab   :  { %996 = vperm.xlu1 %1130, %v91_v32  }
 0x573   :  { %v828_v7 = vpop.f32.mrb[16].mxu1 }
 0x574   :  { %v829_v35 = vadd.f32 %v828_v7, %v780_v33  ;;  %v830_v36 = vpop.f32.mrb[17].mxu1 }
 0x575   :  { %v831_v37 = vadd.f32 %v830_v36, %v780_v33  ;;  %v832_v11 = vpop.f32.mrb[18].mxu1 }
 0x576   :  { %v833_v38 = vadd.f32 %v832_v11, %v784_v34  ;;  %v834_v39 = vpop.f32.mrb[19].mxu1  ;;  %v847_v40 = vmax.f32 %v829_v35, 0.0 }
 0x577   :  { %v835_v10 = vadd.f32 %v834_v39, %v784_v34  ;;  %v848_v42 = vmax.f32 %v831_v37, 0.0  ;;  %v966_v34 = vpop.permute.xlu0 %965 }
 0x578   :  { %v849_v41 = vmax.f32 %v833_v38, 0.0 }
 0x579   :  { %v850_v43 = vmax.f32 %v835_v10, 0.0 }
 0x57a   :  { %v855_v44 = vpack.c.bf16 %v849_v41, %v847_v40 }
 0x57b   :  { %v856_v45 = vpack.c.bf16 %v850_v43, %v848_v42  ;;  %v838_v46 = vpop.f32.mrb[20].mxu1 }
 0x57c   :  { %v839_v47 = vadd.f32 %v838_v46, %v788_v8  ;;  %v840_v48 = vpop.f32.mrb[21].mxu1 }
 0x57d   :  { %v841_v50 = vadd.f32 %v840_v48, %v788_v8  ;;  %v842_v51 = vpop.f32.mrb[22].mxu1  ;;  %891 = vmatprep.subr.bf16.mxu0 %v856_v45  ;;  %1106 = vmatprep.subr.bf16.mxu1 %v856_v45 }
 0x57e   :  { %v843_v52 = vadd.f32 %v842_v51, %v792_v49  ;;  %v844_v53 = vpop.f32.mrb[23].mxu1  ;;  %892 = vmatpush1.bf16.msra.mxu0 %v855_v44  ;;  %1108 = vmatpush1.bf16.msra.mxu1 %v855_v44  ;;  %v851_v55 = vmax.f32 %v839_v47, 0.0 }
 0x57f   :  { %v845_v54 = vadd.f32 %v844_v53, %v792_v49  ;;  %v852_v62 = vmax.f32 %v841_v50, 0.0 }
 0x580   :  { %v853_v56 = vmax.f32 %v843_v52, 0.0 }
 0x581   :  { %v854_v63 = vmax.f32 %v845_v54, 0.0  ;;  %v1005_v54 = vlaneseq }
 0x582   :  { %v857_v0 = vpack.c.bf16 %v853_v56, %v851_v55  ;;  %v997_v55 = vpop.permute.xlu1 %996 }
 0x583   :  { %v858_v2 = vpack.c.bf16 %v854_v63, %v852_v62  ;;  %vm1037_vm3 = vcmp.lt.s32.totalorder %v1005_v54, 256 }
 0x585   :  { %893 = vmatprep.subr.bf16.mxu0 %v858_v2  ;;  %1107 = vmatprep.subr.bf16.mxu1 %v858_v2  ;;  %v1006_v2 = vshrl.u32 %v1005_v54, 7 }
 0x586   :  { %894 = vmatpush1.bf16.msra.mxu0 %v857_v0  ;;  %1109 = vmatpush1.bf16.msra.mxu1 %v857_v0 }
 0x589   :  { %1104 = vmatmul.mubr.msk.bf16.vlgmr.msra.gmra.mrb[32].mxu0 %vm400_vm2, %v1199_v3  ;;  %1105 = vmatmul.mubr.msk.bf16.vlgmr.msra.gmra.mrb[24].mxu1 %vm400_vm2, %v1200_v4  ;;  %v1007_v4 = vsub.s32 0, %v1006_v2 }
 0x65c   :  { %v925_v12 = vpop.f32.mrb[32].mxu0  ;;  %v935_v13 = vpop.f32.mrb[24].mxu1 }
 0x65d   :  { %v926_v14 = vadd.f32 %v925_v12, %v861_v5  ;;  %v927_v15 = vpop.f32.mrb[33].mxu0  ;;  %v936_v16 = vadd.f32 %v935_v13, %v869_v6  ;;  %v937_v17 = vpop.f32.mrb[25].mxu1 }
 0x65e   :  { %v928_v18 = vadd.f32 %v927_v15, %v861_v5  ;;  %v929_v19 = vpop.f32.mrb[34].mxu0  ;;  %v939_v20 = vpop.f32.mrb[26].mxu1  ;;  %v938_v22 = vadd.f32 %v937_v17, %v869_v6  ;;  %v1003_v5 = vld [vmem:[%s1670_s1] sm:$0x3]  ;;  %v1011_v6 = vsub.s32 1, %v1006_v2 }
 0x65f   :  { %1249 = vtanh.f32 %v926_v14  ;;  %v930_v21 = vadd.f32 %v929_v19, %v865_v9  ;;  %v931_v23 = vpop.f32.mrb[35].mxu0  ;;  %v941_v24 = vpop.f32.mrb[27].mxu1  ;;  %v940_v57 = vadd.f32 %v939_v20, %v873_v26  ;;  %v1008_v13 = vrot.slane %v1003_v5, %v1007_v4 }
 0x660   :  { %1251 = vtanh.f32 %v928_v18  ;;  %v932_v25 = vadd.f32 %v931_v23, %v865_v9  ;;  %v942_v58 = vadd.f32 %v941_v24, %v873_v26  ;;  %v1276_v9 = vmov 1966171168  }
 0x661   :  { %1253 = vtanh.f32 %v936_v16  ;;  %v1021_v12 = vunpack.c.l.s4 %v1276_v9  ;;  %v1012_v15 = vrot.slane %v1003_v5, %v1011_v6 }
 0x662   :  { %1255 = vtanh.f32 %v930_v21 }
 0x663   :  { %1257 = vtanh.f32 %v938_v22  ;;  %v1022_v14 = vunpack.c.0.s8 %v1021_v12 }
 0x664   :  { %1259 = vtanh.f32 %v932_v25 }
 0x665   :  { %1261 = vtanh.f32 %v940_v57  ;;  %v1025_v19 = vsub.s32 %v1022_v14, %v1006_v2 }
 0x666   :  { %1263 = vtanh.f32 %v942_v58 }
 0x669   :  { %v1250_v61 = vpop.eup %1249 }
 0x66a   :  { %v1252_v27 = vpop.eup %1251  ;;  %v968_v32 = vmul.f32 %v1250_v61, %v954_v60 }
 0x66b   :  { %v1254_v28 = vpop.eup %1253  ;;  %v969_v36 = vmul.f32 %v1252_v27, %v954_v60 }
 0x66c   :  { %v1256_v29 = vpop.eup %1255  ;;  %v972_v11 = vmul.f32 %v1254_v28, %v962_v30 }
 0x66d   :  { %v1258_v31 = vpop.eup %1257  ;;  %v970_v1 = vmul.f32 %v1256_v29, %v958_v59 }
 0x66e   :  { %v1260_v33 = vpop.eup %1259  ;;  %v973_v10 = vmul.f32 %v1258_v31, %v962_v30 }
 0x66f   :  { %v1262_v7 = vpop.eup %1261  ;;  %v971_v35 = vmul.f32 %v1260_v33, %v958_v59  ;;  %v976_v37 = vadd.f32 %v970_v1, %v968_v32 }
 0x670   :  { %v1264_v38 = vpop.eup %1263  ;;  %v974_v41 = vmul.f32 %v1262_v7, %v966_v34 }
 0x671   :  { %v985_v39 = vadd.f32 %v971_v35, %v969_v36  ;;  %v977_v40 = vadd.f32 %v976_v37, %v972_v11  ;;  %v975_v8 = vmul.f32 %v1264_v38, %v966_v34 }
 0x673   :  { %v986_v42 = vadd.f32 %v985_v39, %v973_v10  ;;  %v978_v43 = vadd.f32 %v977_v40, %v974_v41 }
 0x675   :  { %v979_v44 = vrot.slane %v978_v43, 4  ;;  %v987_v45 = vadd.f32 %v986_v42, %v975_v8 }
 0x677   :  { %v980_v46 = vadd.f32 %v979_v44, %v978_v43  ;;  %v988_v47 = vrot.slane %v987_v45, 4 }
 0x679   :  { %v989_v48 = vadd.f32 %v988_v47, %v987_v45  ;;  %v981_v49 = vrot.slane %v980_v46, 2 }
 0x67b   :  { %v982_v50 = vadd.f32 %v981_v49, %v980_v46  ;;  %v990_v51 = vrot.slane %v989_v48, 2 }
 0x67d   :  { %v983_v52 = vrot.slane %v982_v50, 1  ;;  %v991_v53 = vadd.f32 %v990_v51, %v989_v48 }
 0x67f   :  { %v984_v56 = vadd.f32 %v983_v52, %v982_v50  ;;  %v992_v62 = vrot.slane %v991_v53, 1 }
 0x681   :  { %v993_v63 = vadd.f32 %v992_v62, %v991_v53  ;;  %v999_v0 = vadd.f32 %v997_v55, %v984_v56 }
 0x683   :  { %v1000_v3 = vadd.f32 %v997_v55, %v993_v63  ;;  %1265 = vtanh.f32 %v999_v0 }
 0x685   :  { %1267 = vtanh.f32 %v1000_v3 }
 0x68d   :  { %v1266_v16 = vpop.eup %1265 }
 0x68e   :  { %v1015_v17 = vadd.f32 %v1266_v16, %v1008_v13 }
 0x68f   :  { %v1268_v18 = vpop.eup %1267 }
 0x690   :  { %v1016_v20 = vadd.f32 %v1268_v18, %v1012_v15 }
 0x692   :  { %v1019_v21 = vcombine.low %v1015_v17, %v1016_v20 }
 0x694   :  { %v1026_v22 = vrot.slane %v1019_v21, %v1025_v19 }
 0x696   :  { %v1033_v23 = vrot.slane %v1026_v22, %v1025_v19 }
 0x698   :  { %1039 = vst.msk [vmem:[%s1671_s5] sm:$0x3] %vm1037_vm3, %v1033_v23 }

</bundles_post_ra>
